<compile_context>
chip_gen: v5e
topology: v5e:2x2
jax: 0.10.0
libtpu: 0.0.40
codegen_flags: <defaults>
</compile_context>

<pallas_src>
import functools

import jax
import jax.numpy as jnp
from jax.experimental import pallas as pl
from jax.experimental.pallas import tpu as pltpu

NEG_SLOPE = 0.01  # nn.LeakyReLU default negative_slope


def _downsample_kernel(ev0_ref, ev1_ref, ev2_ref,   # even padded cols, rows 2*oh+kh
                       od0_ref, od1_ref, od2_ref,   # odd  padded cols, rows 2*oh+kh
                       w_ref, b_ref, o_ref):
    # ev*_ref: (We, C)   compute dtype  (We >= Wo+1)
    # od*_ref: (Wd, C)   compute dtype  (Wd >= Wo)
    # w_ref  : (9, C, Cout)  compute dtype, VMEM-resident (constant index map)
    # b_ref  : (1, Cout)     f32,          VMEM-resident
    # o_ref  : (Wo, Cout)    out dtype
    Wo, Cout = o_ref.shape
    acc = jnp.zeros((Wo, Cout), jnp.float32)
    evs = (ev0_ref, ev1_ref, ev2_ref)
    ods = (od0_ref, od1_ref, od2_ref)
    for kh in range(3):
        ev = evs[kh][...]                      # (We, C)
        od = ods[kh][...]                      # (Wd, C)
        # kw = 0 -> even cols [0, Wo); kw = 1 -> odd cols [0, Wo);
        # kw = 2 -> even cols [1, Wo+1): all static contiguous slices.
        taps = (ev[0:Wo, :], od[0:Wo, :], ev[1:Wo + 1, :])
        for kw in range(3):
            acc = acc + jnp.dot(taps[kw], w_ref[3 * kh + kw],
                                preferred_element_type=jnp.float32)
    acc = acc + b_ref[...]                     # bias, f32
    # LeakyReLU epilogue in f32 (v5e has no bf16 VPU); cast only at the store.
    o_ref[...] = jnp.where(acc >= 0, acc, NEG_SLOPE * acc).astype(o_ref.dtype)


def _vmem_limit_bytes():
    # Generation-aware VMEM limit: ~3/4 of physical per-TC VMEM
    # (v5e/v6e: 128 MiB -> 96 MiB, v7x: 64 MiB -> 48 MiB).
    try:
        cap = pltpu.get_tpu_info().vmem_capacity_bytes
    except Exception:
        cap = 64 << 20
    return max(32 << 20, min(int(cap) * 3 // 4, 96 << 20))


def downsample_pallas(x_nchw, weight, bias, *,
                      compute_dtype=jnp.bfloat16, out_dtype=None):
    """x_nchw: (N, C, H, W); weight: (Cout, Cin, 3, 3); bias: (Cout,)."""
    N, C, H, W = x_nchw.shape
    Cout, Cin, KH, KW = weight.shape
    assert (Cin, KH, KW) == (C, 3, 3)
    out_dtype = x_nchw.dtype if out_dtype is None else out_dtype

    # Conv2d(stride=2, padding=1, kernel=3) output extent.
    Ho = (H + 2 - 3) // 2 + 1
    Wo = (W + 2 - 3) // 2 + 1

    # --- glue (single fused pass): NCHW -> NHWC, cast, pad, even/odd W split ---
    xh = jnp.transpose(x_nchw, (0, 2, 3, 1)).astype(compute_dtype)   # (N,H,W,C)
    xp = jnp.pad(xh, ((0, 0), (1, 1), (1, 1), (0, 0)))               # (N,H+2,W+2,C)
    x_ev = xp[:, :, 0::2, :]    # even padded columns: (N, H+2, We, C)
    x_od = xp[:, :, 1::2, :]    # odd  padded columns: (N, H+2, Wd, C)
    We, Wd = x_ev.shape[2], x_od.shape[2]
    assert We >= Wo + 1 and Wd >= Wo

    # Weights: (Cout, Cin, 3, 3) -> (9, Cin, Cout), row k = 3*kh + kw.
    w_all = jnp.transpose(weight, (2, 3, 1, 0)).reshape(9, Cin, Cout)
    w_all = w_all.astype(compute_dtype)
    b2 = bias.astype(jnp.float32).reshape(1, Cout)

    def tap_spec(cols, kh):
        # One padded input row (padded row index 2*oh + kh), all cols, all C.
        return pl.BlockSpec((None, None, cols, C),
                            lambda n, oh, kh=kh: (n, 2 * oh + kh, 0, 0))

    in_specs = [
        tap_spec(We, 0), tap_spec(We, 1), tap_spec(We, 2),
        tap_spec(Wd, 0), tap_spec(Wd, 1), tap_spec(Wd, 2),
        pl.BlockSpec((9, Cin, Cout), lambda n, oh: (0, 0, 0)),   # weights, resident
        pl.BlockSpec((1, Cout), lambda n, oh: (0, 0)),           # bias, resident
    ]
    out_spec = pl.BlockSpec((None, None, Wo, Cout), lambda n, oh: (n, oh, 0, 0))

    in_item = jnp.dtype(compute_dtype).itemsize
    out_item = jnp.dtype(out_dtype).itemsize
    cost = pl.CostEstimate(
        flops=2 * N * Ho * Wo * 9 * Cin * Cout,
        transcendentals=0,
        bytes_accessed=(N * Ho * 3 * (We + Wd) * C * in_item
                        + 9 * Cin * Cout * in_item + Cout * 4
                        + N * Ho * Wo * Cout * out_item),
    )

    out_nhwc = pl.pallas_call(
        _downsample_kernel,
        out_shape=jax.ShapeDtypeStruct((N, Ho, Wo, Cout), out_dtype),
        grid=(N, Ho),
        in_specs=in_specs,
        out_specs=out_spec,
        compiler_params=pltpu.CompilerParams(
            dimension_semantics=("parallel", "parallel"),
            vmem_limit_bytes=_vmem_limit_bytes()),
        cost_estimate=cost,
    )(x_ev, x_ev, x_ev, x_od, x_od, x_od, w_all, b2)

    # Output glue is over the (4x smaller) output only.
    return jnp.transpose(out_nhwc, (0, 3, 1, 2))                  # (N, Cout, Ho, Wo)


def _reference(x_nchw, weight, bias):
    y = jax.lax.conv_general_dilated(
        x_nchw, weight, window_strides=(2, 2), padding=((1, 1), (1, 1)),
        dimension_numbers=("NCHW", "OIHW", "NCHW"),
    ) + bias.reshape(1, -1, 1, 1)
    return jnp.where(y >= 0, y, NEG_SLOPE * y)


if __name__ == "__main__":
    key = jax.random.PRNGKey(0)
    kx, kw_, kb = jax.random.split(key, 3)

    N, C, H, W = 2, 4, 16, 16
    x = jax.random.normal(kx, (N, C, H, W), dtype=jnp.float32)

    # Deterministic synthetic Conv2d(C, C, 3, 2, 1) parameters.
    fan_in = C * 3 * 3
    bound = 1.0 / (fan_in ** 0.5)
    weight = jax.random.uniform(kw_, (C, C, 3, 3), jnp.float32, -bound, bound)
    bias = jax.random.uniform(kb, (C,), jnp.float32, -bound, bound)

    ref = _reference(x, weight, bias)

    # f32-operand path: tight check. (For strict f32 parity at large K, pass
    # precision=lax.Precision.HIGHEST to the in-kernel dots; K is tiny here.)
    f32_fn = jax.jit(functools.partial(
        downsample_pallas, compute_dtype=jnp.float32, out_dtype=jnp.float32))
    out_f32 = jax.block_until_ready(f32_fn(x, weight, bias))
    assert out_f32.shape == (N, C, 8, 8), out_f32.shape
    assert jnp.allclose(out_f32, ref, atol=1e-4, rtol=1e-4), \
        float(jnp.max(jnp.abs(out_f32 - ref)))

    # bf16 compute + bf16 writeback (recommended default on all generations).
    bf16_fn = jax.jit(functools.partial(
        downsample_pallas, compute_dtype=jnp.bfloat16, out_dtype=jnp.bfloat16))
    out_bf16 = jax.block_until_ready(bf16_fn(x, weight, bias))
    assert out_bf16.shape == (N, C, 8, 8), out_bf16.shape
    assert out_bf16.dtype == jnp.bfloat16
    assert jnp.allclose(out_bf16.astype(jnp.float32), ref, atol=5e-2, rtol=5e-2), \
        float(jnp.max(jnp.abs(out_bf16.astype(jnp.float32) - ref)))

    print("KERNEL_OK")
</pallas_src>

<mosaic_0001>
module attributes {stable_mosaic.version = 11 : i64} {
  func.func @_downsample_kernel(%arg0: i32, %arg1: i32, %arg2: memref<1x1x9x4xf32, #tpu.memory_space<vmem>>, %arg3: memref<1x1x9x4xf32, #tpu.memory_space<vmem>>, %arg4: memref<1x1x9x4xf32, #tpu.memory_space<vmem>>, %arg5: memref<1x1x9x4xf32, #tpu.memory_space<vmem>>, %arg6: memref<1x1x9x4xf32, #tpu.memory_space<vmem>>, %arg7: memref<1x1x9x4xf32, #tpu.memory_space<vmem>>, %arg8: memref<9x4x4xf32, #tpu.memory_space<vmem>>, %arg9: memref<1x4xf32, #tpu.memory_space<vmem>>, %arg10: memref<1x1x8x4xf32, #tpu.memory_space<vmem>>) attributes {dimension_semantics = [#tpu.dimension_semantics<parallel>, #tpu.dimension_semantics<parallel>], iteration_bounds = array<i64: 2, 8>, scalar_prefetch = 0 : i64, scratch_operands = 0 : i64, tpu.core_type = #tpu.core_type<tc>, window_params = [{transform_indices = @transform_0, window_bounds = array<i64: 1, 1, 9, 4>}, {transform_indices = @transform_1, window_bounds = array<i64: 1, 1, 9, 4>}, {transform_indices = @transform_2, window_bounds = array<i64: 1, 1, 9, 4>}, {transform_indices = @transform_3, window_bounds = array<i64: 1, 1, 9, 4>}, {transform_indices = @transform_4, window_bounds = array<i64: 1, 1, 9, 4>}, {transform_indices = @transform_5, window_bounds = array<i64: 1, 1, 9, 4>}, {pipeline_mode = #tpu.pipeline_mode<synchronous>, transform_indices = @transform_6, window_bounds = array<i64: 9, 4, 4>}, {pipeline_mode = #tpu.pipeline_mode<synchronous>, transform_indices = @transform_7, window_bounds = array<i64: 1, 4>}, {transform_indices = @transform_8, window_bounds = array<i64: 1, 1, 8, 4>}]} {
    %cst = arith.constant 0.000000e+00 : f32
    %0 = vector.broadcast %cst : f32 to vector<8x4xf32>
    %c0 = arith.constant 0 : index
    %c0_0 = arith.constant 0 : index
    %c0_1 = arith.constant 0 : index
    %c0_2 = arith.constant 0 : index
    %1 = vector.load %arg2[%c0, %c0_0, %c0_1, %c0_2] : memref<1x1x9x4xf32, #tpu.memory_space<vmem>>, vector<1x1x9x4xf32>
    %2 = vector.shape_cast %1 : vector<1x1x9x4xf32> to vector<9x4xf32>
    %c0_3 = arith.constant 0 : index
    %c0_4 = arith.constant 0 : index
    %c0_5 = arith.constant 0 : index
    %c0_6 = arith.constant 0 : index
    %3 = vector.load %arg5[%c0_3, %c0_4, %c0_5, %c0_6] : memref<1x1x9x4xf32, #tpu.memory_space<vmem>>, vector<1x1x9x4xf32>
    %4 = vector.shape_cast %3 : vector<1x1x9x4xf32> to vector<9x4xf32>
    %5 = vector.extract_strided_slice %2 {offsets = [0, 0], sizes = [8, 4], strides = [1, 1]} : vector<9x4xf32> to vector<8x4xf32>
    %6 = vector.extract_strided_slice %4 {offsets = [0, 0], sizes = [8, 4], strides = [1, 1]} : vector<9x4xf32> to vector<8x4xf32>
    %7 = vector.extract_strided_slice %2 {offsets = [1, 0], sizes = [8, 4], strides = [1, 1]} : vector<9x4xf32> to vector<8x4xf32>
    %c0_7 = arith.constant 0 : index
    %c0_8 = arith.constant 0 : index
    %c0_9 = arith.constant 0 : index
    %8 = vector.load %arg8[%c0_7, %c0_8, %c0_9] : memref<9x4x4xf32, #tpu.memory_space<vmem>>, vector<1x4x4xf32>
    %9 = vector.shape_cast %8 : vector<1x4x4xf32> to vector<4x4xf32>
    %cst_10 = arith.constant dense<0.000000e+00> : vector<8x4xf32>
    %10 = tpu.matmul %5, %9, %cst_10 {dimension_numbers = #tpu.dot_dimension_numbers<[1], [0], [0], [1], [0, 0, 1, 1], [], []>} : vector<8x4xf32>, vector<4x4xf32>, vector<8x4xf32> -> vector<8x4xf32>
    %11 = arith.addf %0, %10 : vector<8x4xf32>
    %c1 = arith.constant 1 : index
    %c0_11 = arith.constant 0 : index
    %c0_12 = arith.constant 0 : index
    %12 = vector.load %arg8[%c1, %c0_11, %c0_12] : memref<9x4x4xf32, #tpu.memory_space<vmem>>, vector<1x4x4xf32>
    %13 = vector.shape_cast %12 : vector<1x4x4xf32> to vector<4x4xf32>
    %cst_13 = arith.constant dense<0.000000e+00> : vector<8x4xf32>
    %14 = tpu.matmul %6, %13, %cst_13 {dimension_numbers = #tpu.dot_dimension_numbers<[1], [0], [0], [1], [0, 0, 1, 1], [], []>} : vector<8x4xf32>, vector<4x4xf32>, vector<8x4xf32> -> vector<8x4xf32>
    %15 = arith.addf %11, %14 : vector<8x4xf32>
    %c2 = arith.constant 2 : index
    %c0_14 = arith.constant 0 : index
    %c0_15 = arith.constant 0 : index
    %16 = vector.load %arg8[%c2, %c0_14, %c0_15] : memref<9x4x4xf32, #tpu.memory_space<vmem>>, vector<1x4x4xf32>
    %17 = vector.shape_cast %16 : vector<1x4x4xf32> to vector<4x4xf32>
    %cst_16 = arith.constant dense<0.000000e+00> : vector<8x4xf32>
    %18 = tpu.matmul %7, %17, %cst_16 {dimension_numbers = #tpu.dot_dimension_numbers<[1], [0], [0], [1], [0, 0, 1, 1], [], []>} : vector<8x4xf32>, vector<4x4xf32>, vector<8x4xf32> -> vector<8x4xf32>
    %19 = arith.addf %15, %18 : vector<8x4xf32>
    %c0_17 = arith.constant 0 : index
    %c0_18 = arith.constant 0 : index
    %c0_19 = arith.constant 0 : index
    %c0_20 = arith.constant 0 : index
    %20 = vector.load %arg3[%c0_17, %c0_18, %c0_19, %c0_20] : memref<1x1x9x4xf32, #tpu.memory_space<vmem>>, vector<1x1x9x4xf32>
    %21 = vector.shape_cast %20 : vector<1x1x9x4xf32> to vector<9x4xf32>
    %c0_21 = arith.constant 0 : index
    %c0_22 = arith.constant 0 : index
    %c0_23 = arith.constant 0 : index
    %c0_24 = arith.constant 0 : index
    %22 = vector.load %arg6[%c0_21, %c0_22, %c0_23, %c0_24] : memref<1x1x9x4xf32, #tpu.memory_space<vmem>>, vector<1x1x9x4xf32>
    %23 = vector.shape_cast %22 : vector<1x1x9x4xf32> to vector<9x4xf32>
    %24 = vector.extract_strided_slice %21 {offsets = [0, 0], sizes = [8, 4], strides = [1, 1]} : vector<9x4xf32> to vector<8x4xf32>
    %25 = vector.extract_strided_slice %23 {offsets = [0, 0], sizes = [8, 4], strides = [1, 1]} : vector<9x4xf32> to vector<8x4xf32>
    %26 = vector.extract_strided_slice %21 {offsets = [1, 0], sizes = [8, 4], strides = [1, 1]} : vector<9x4xf32> to vector<8x4xf32>
    %c3 = arith.constant 3 : index
    %c0_25 = arith.constant 0 : index
    %c0_26 = arith.constant 0 : index
    %27 = vector.load %arg8[%c3, %c0_25, %c0_26] : memref<9x4x4xf32, #tpu.memory_space<vmem>>, vector<1x4x4xf32>
    %28 = vector.shape_cast %27 : vector<1x4x4xf32> to vector<4x4xf32>
    %cst_27 = arith.constant dense<0.000000e+00> : vector<8x4xf32>
    %29 = tpu.matmul %24, %28, %cst_27 {dimension_numbers = #tpu.dot_dimension_numbers<[1], [0], [0], [1], [0, 0, 1, 1], [], []>} : vector<8x4xf32>, vector<4x4xf32>, vector<8x4xf32> -> vector<8x4xf32>
    %30 = arith.addf %19, %29 : vector<8x4xf32>
    %c4 = arith.constant 4 : index
    %c0_28 = arith.constant 0 : index
    %c0_29 = arith.constant 0 : index
    %31 = vector.load %arg8[%c4, %c0_28, %c0_29] : memref<9x4x4xf32, #tpu.memory_space<vmem>>, vector<1x4x4xf32>
    %32 = vector.shape_cast %31 : vector<1x4x4xf32> to vector<4x4xf32>
    %cst_30 = arith.constant dense<0.000000e+00> : vector<8x4xf32>
    %33 = tpu.matmul %25, %32, %cst_30 {dimension_numbers = #tpu.dot_dimension_numbers<[1], [0], [0], [1], [0, 0, 1, 1], [], []>} : vector<8x4xf32>, vector<4x4xf32>, vector<8x4xf32> -> vector<8x4xf32>
    %34 = arith.addf %30, %33 : vector<8x4xf32>
    %c5 = arith.constant 5 : index
    %c0_31 = arith.constant 0 : index
    %c0_32 = arith.constant 0 : index
    %35 = vector.load %arg8[%c5, %c0_31, %c0_32] : memref<9x4x4xf32, #tpu.memory_space<vmem>>, vector<1x4x4xf32>
    %36 = vector.shape_cast %35 : vector<1x4x4xf32> to vector<4x4xf32>
    %cst_33 = arith.constant dense<0.000000e+00> : vector<8x4xf32>
    %37 = tpu.matmul %26, %36, %cst_33 {dimension_numbers = #tpu.dot_dimension_numbers<[1], [0], [0], [1], [0, 0, 1, 1], [], []>} : vector<8x4xf32>, vector<4x4xf32>, vector<8x4xf32> -> vector<8x4xf32>
    %38 = arith.addf %34, %37 : vector<8x4xf32>
    %c0_34 = arith.constant 0 : index
    %c0_35 = arith.constant 0 : index
    %c0_36 = arith.constant 0 : index
    %c0_37 = arith.constant 0 : index
    %39 = vector.load %arg4[%c0_34, %c0_35, %c0_36, %c0_37] : memref<1x1x9x4xf32, #tpu.memory_space<vmem>>, vector<1x1x9x4xf32>
    %40 = vector.shape_cast %39 : vector<1x1x9x4xf32> to vector<9x4xf32>
    %c0_38 = arith.constant 0 : index
    %c0_39 = arith.constant 0 : index
    %c0_40 = arith.constant 0 : index
    %c0_41 = arith.constant 0 : index
    %41 = vector.load %arg7[%c0_38, %c0_39, %c0_40, %c0_41] : memref<1x1x9x4xf32, #tpu.memory_space<vmem>>, vector<1x1x9x4xf32>
    %42 = vector.shape_cast %41 : vector<1x1x9x4xf32> to vector<9x4xf32>
    %43 = vector.extract_strided_slice %40 {offsets = [0, 0], sizes = [8, 4], strides = [1, 1]} : vector<9x4xf32> to vector<8x4xf32>
    %44 = vector.extract_strided_slice %42 {offsets = [0, 0], sizes = [8, 4], strides = [1, 1]} : vector<9x4xf32> to vector<8x4xf32>
    %45 = vector.extract_strided_slice %40 {offsets = [1, 0], sizes = [8, 4], strides = [1, 1]} : vector<9x4xf32> to vector<8x4xf32>
    %c6 = arith.constant 6 : index
    %c0_42 = arith.constant 0 : index
    %c0_43 = arith.constant 0 : index
    %46 = vector.load %arg8[%c6, %c0_42, %c0_43] : memref<9x4x4xf32, #tpu.memory_space<vmem>>, vector<1x4x4xf32>
    %47 = vector.shape_cast %46 : vector<1x4x4xf32> to vector<4x4xf32>
    %cst_44 = arith.constant dense<0.000000e+00> : vector<8x4xf32>
    %48 = tpu.matmul %43, %47, %cst_44 {dimension_numbers = #tpu.dot_dimension_numbers<[1], [0], [0], [1], [0, 0, 1, 1], [], []>} : vector<8x4xf32>, vector<4x4xf32>, vector<8x4xf32> -> vector<8x4xf32>
    %49 = arith.addf %38, %48 : vector<8x4xf32>
    %c7 = arith.constant 7 : index
    %c0_45 = arith.constant 0 : index
    %c0_46 = arith.constant 0 : index
    %50 = vector.load %arg8[%c7, %c0_45, %c0_46] : memref<9x4x4xf32, #tpu.memory_space<vmem>>, vector<1x4x4xf32>
    %51 = vector.shape_cast %50 : vector<1x4x4xf32> to vector<4x4xf32>
    %cst_47 = arith.constant dense<0.000000e+00> : vector<8x4xf32>
    %52 = tpu.matmul %44, %51, %cst_47 {dimension_numbers = #tpu.dot_dimension_numbers<[1], [0], [0], [1], [0, 0, 1, 1], [], []>} : vector<8x4xf32>, vector<4x4xf32>, vector<8x4xf32> -> vector<8x4xf32>
    %53 = arith.addf %49, %52 : vector<8x4xf32>
    %c8 = arith.constant 8 : index
    %c0_48 = arith.constant 0 : index
    %c0_49 = arith.constant 0 : index
    %54 = vector.load %arg8[%c8, %c0_48, %c0_49] : memref<9x4x4xf32, #tpu.memory_space<vmem>>, vector<1x4x4xf32>
    %55 = vector.shape_cast %54 : vector<1x4x4xf32> to vector<4x4xf32>
    %cst_50 = arith.constant dense<0.000000e+00> : vector<8x4xf32>
    %56 = tpu.matmul %45, %55, %cst_50 {dimension_numbers = #tpu.dot_dimension_numbers<[1], [0], [0], [1], [0, 0, 1, 1], [], []>} : vector<8x4xf32>, vector<4x4xf32>, vector<8x4xf32> -> vector<8x4xf32>
    %57 = arith.addf %53, %56 : vector<8x4xf32>
    %c0_51 = arith.constant 0 : index
    %c0_52 = arith.constant 0 : index
    %58 = vector.load %arg9[%c0_51, %c0_52] : memref<1x4xf32, #tpu.memory_space<vmem>>, vector<1x4xf32>
    %59 = vector.broadcast %58 : vector<1x4xf32> to vector<8x4xf32>
    %60 = arith.addf %57, %59 : vector<8x4xf32>
    %cst_53 = arith.constant 0.000000e+00 : f32
    %61 = vector.broadcast %cst_53 : f32 to vector<8x4xf32>
    %62 = arith.cmpf oge, %60, %61 : vector<8x4xf32>
    %cst_54 = arith.constant 0.00999999977 : f32
    %63 = vector.broadcast %cst_54 : f32 to vector<8x4xf32>
    %64 = arith.mulf %63, %60 : vector<8x4xf32>
    %65 = arith.select %62, %60, %64 : vector<8x4xi1>, vector<8x4xf32>
    %c0_55 = arith.constant 0 : index
    %c0_56 = arith.constant 0 : index
    %c0_57 = arith.constant 0 : index
    %c0_58 = arith.constant 0 : index
    %66 = vector.load %arg10[%c0_55, %c0_56, %c0_57, %c0_58] : memref<1x1x8x4xf32, #tpu.memory_space<vmem>>, vector<1x1x8x4xf32>
    %67 = vector.shape_cast %66 : vector<1x1x8x4xf32> to vector<8x4xf32>
    %68 = vector.shape_cast %65 : vector<8x4xf32> to vector<1x1x8x4xf32>
    tpu.vector_store %arg10[%c0_55, %c0_56, %c0_57, %c0_58], %68 {strides = array<i32>} : memref<1x1x8x4xf32, #tpu.memory_space<vmem>>, vector<1x1x8x4xf32>,
    return
  }
  func.func @transform_0(%arg0: i32, %arg1: i32) -> (i32, i32, i32, i32) {
    %c2_i32 = arith.constant 2 : i32
    %0 = arith.muli %c2_i32, %arg1 : i32
    %c0_i32 = arith.constant 0 : i32
    %1 = arith.addi %0, %c0_i32 : i32
    %c0_i32_0 = arith.constant 0 : i32
    %c0_i32_1 = arith.constant 0 : i32
    %c0_i32_2 = arith.constant 0 : i32
    return %arg0, %1, %c0_i32_0, %c0_i32_1 : i32, i32, i32, i32
  }
  func.func @transform_1(%arg0: i32, %arg1: i32) -> (i32, i32, i32, i32) {
    %c2_i32 = arith.constant 2 : i32
    %0 = arith.muli %c2_i32, %arg1 : i32
    %c1_i32 = arith.constant 1 : i32
    %1 = arith.addi %0, %c1_i32 : i32
    %c0_i32 = arith.constant 0 : i32
    %c0_i32_0 = arith.constant 0 : i32
    %c0_i32_1 = arith.constant 0 : i32
    return %arg0, %1, %c0_i32, %c0_i32_0 : i32, i32, i32, i32
  }
  func.func @transform_2(%arg0: i32, %arg1: i32) -> (i32, i32, i32, i32) {
    %c2_i32 = arith.constant 2 : i32
    %0 = arith.muli %c2_i32, %arg1 : i32
    %c2_i32_0 = arith.constant 2 : i32
    %1 = arith.addi %0, %c2_i32_0 : i32
    %c0_i32 = arith.constant 0 : i32
    %c0_i32_1 = arith.constant 0 : i32
    %c0_i32_2 = arith.constant 0 : i32
    return %arg0, %1, %c0_i32, %c0_i32_1 : i32, i32, i32, i32
  }
  func.func @transform_3(%arg0: i32, %arg1: i32) -> (i32, i32, i32, i32) {
    %c2_i32 = arith.constant 2 : i32
    %0 = arith.muli %c2_i32, %arg1 : i32
    %c0_i32 = arith.constant 0 : i32
    %1 = arith.addi %0, %c0_i32 : i32
    %c0_i32_0 = arith.constant 0 : i32
    %c0_i32_1 = arith.constant 0 : i32
    %c0_i32_2 = arith.constant 0 : i32
    return %arg0, %1, %c0_i32_0, %c0_i32_1 : i32, i32, i32, i32
  }
  func.func @transform_4(%arg0: i32, %arg1: i32) -> (i32, i32, i32, i32) {
    %c2_i32 = arith.constant 2 : i32
    %0 = arith.muli %c2_i32, %arg1 : i32
    %c1_i32 = arith.constant 1 : i32
    %1 = arith.addi %0, %c1_i32 : i32
    %c0_i32 = arith.constant 0 : i32
    %c0_i32_0 = arith.constant 0 : i32
    %c0_i32_1 = arith.constant 0 : i32
    return %arg0, %1, %c0_i32, %c0_i32_0 : i32, i32, i32, i32
  }
  func.func @transform_5(%arg0: i32, %arg1: i32) -> (i32, i32, i32, i32) {
    %c2_i32 = arith.constant 2 : i32
    %0 = arith.muli %c2_i32, %arg1 : i32
    %c2_i32_0 = arith.constant 2 : i32
    %1 = arith.addi %0, %c2_i32_0 : i32
    %c0_i32 = arith.constant 0 : i32
    %c0_i32_1 = arith.constant 0 : i32
    %c0_i32_2 = arith.constant 0 : i32
    return %arg0, %1, %c0_i32, %c0_i32_1 : i32, i32, i32, i32
  }
  func.func @transform_6(%arg0: i32, %arg1: i32) -> (i32, i32, i32) {
    %c0_i32 = arith.constant 0 : i32
    %c0_i32_0 = arith.constant 0 : i32
    %c0_i32_1 = arith.constant 0 : i32
    %c0_i32_2 = arith.constant 0 : i32
    return %c0_i32, %c0_i32_0, %c0_i32_1 : i32, i32, i32
  }
  func.func @transform_7(%arg0: i32, %arg1: i32) -> (i32, i32) {
    %c0_i32 = arith.constant 0 : i32
    %c0_i32_0 = arith.constant 0 : i32
    %c0_i32_1 = arith.constant 0 : i32
    return %c0_i32, %c0_i32_0 : i32, i32
  }
  func.func @transform_8(%arg0: i32, %arg1: i32) -> (i32, i32, i32, i32) {
    %c0_i32 = arith.constant 0 : i32
    %c0_i32_0 = arith.constant 0 : i32
    %c0_i32_1 = arith.constant 0 : i32
    return %arg0, %arg1, %c0_i32, %c0_i32_0 : i32, i32, i32, i32
  }
}

</mosaic_0001>

<bundles_post_ra>
// kernel: downsample_pallas.1
= control target key start
LH: loop header
LB: loop body
LE: loop exit
PB: predicated region body
PF: predicated region fallthrough
CT: control target
= control target key end

     0   :  { %s1254_s27 = smov 0   ;;  %s1256_s28 = smov 0   ;;  %s1404_s0 = inlined_call_operand.vmem [shape: f32[2,18,9,4], index: 0, kind: input, shape index: {}, may-alias: {0,1,2}]   ;;  %s1405_s1 = inlined_call_operand.vmem [shape: f32[2,18,9,4], index: 1, kind: input, shape index: {}, may-alias: {0,1,2}]   ;;  %s1406_s2 = inlined_call_operand.vmem [shape: f32[2,18,9,4], index: 2, kind: input, shape index: {}, may-alias: {0,1,2}]   ;;  %s1407_s3 = inlined_call_operand.vmem [shape: f32[2,18,9,4], index: 3, kind: input, shape index: {}, may-alias: {3,4,5}]   ;;  %s1408_s4 = inlined_call_operand.vmem [shape: f32[2,18,9,4], index: 4, kind: input, shape index: {}, may-alias: {3,4,5}]   ;;  %s1409_s5 = inlined_call_operand.vmem [shape: f32[2,18,9,4], index: 5, kind: input, shape index: {}, may-alias: {3,4,5}]   ;;  %s1410_s6 = inlined_call_operand.vmem [shape: f32[9,4,4], index: 6, kind: input, shape index: {}]   ;;  %s1411_s7 = inlined_call_operand.vmem [shape: f32[1,4], index: 7, kind: input, shape index: {}]   ;;  %s1412_s8 = inlined_call_operand.vmem [shape: f32[2,8,8,4], index: 8, kind: output, shape index: {}]  }
   0x1   :  { %s1258_s29 = smov 0   ;;  %s1260_s30 = smov 0  }
   0x2   :  { %s1262_s9 = smov 0  }
   0x3 LB: > { %s27_s10 = sadd.s32 1, %s1199_s29  ;;  %s30_s11 = sadd.s32 1, %s1203_s30  ;;  %s1207_s9 = sphi %s1262_s9, %s18_s9   ;;  %s1203_s30 = sphi %s1260_s30, %s1422_s30   ;;  %s1199_s29 = sphi %s1258_s29, %s1421_s29   ;;  %s1195_s28 = sphi %s1256_s28, %s1420_s28   ;;  %s1191_s27 = sphi %s1254_s27, %s1419_s27  }
   0x4   : > { %p28_p0 = scmp.ge.s32.totalorder %s27_s10, 8  ;;  %p1078_p1 = scmp.ge.s32.totalorder %s1207_s9, 1 }
   0x5   : > { %p402_p2 = scmp.lt.s32.totalorder %s1207_s9, 17 }
   0x6   : > { %s1424_s10 = smov (%p28_p0, %s27_s10), 0  ;;  %s1426_s11 = smov (!%p28_p0, %s30_s11), %s1203_s30 }
   0x7   : > { %1413 = sst [smem:[#allocation2_spill]] %s1424_s10  ;;  %p403_p3 = pnand %p1078_p1, %p402_p2 }
   0x8   : > { %p32_p4 = scmp.ge.s32.totalorder %s1426_s11, 2  ;;  %s1290_s14 = sshll.u32 (!%p403_p3), %s1191_s27, 1 }
   0x9   : > { %406 = sbr.rel (%p403_p3) target bundleno = 178 (0xb2), region = 52  ;;  %p499_p5 = scmp.lt.s32.totalorder (!%p403_p3), %s1195_s28, 1 }
   0xa   : > { %s1428_s11 = smov (%p32_p4, %s1426_s11), 0  ;;  %p501_p6 = scmp.lt.s32.totalorder (!%p403_p3), %s1290_s14, 17 }
   0xb   : > { %1414 = sst [smem:[#allocation3_spill]] %s1428_s11  ;;  %s510_s15 = sadd.s32 (!%p403_p3), 1, %s1290_s14 }
   0xc   : > { %p1328_p7 = scmp.lt.s32.totalorder (!%p403_p3), %s510_s15, 17  ;;  %s523_s21 = sadd.s32 (!%p403_p3), 2, %s1290_s14 }
   0xd   : > { %p1335_p8 = scmp.lt.s32.totalorder (!%p403_p3), %s523_s21, 17  ;;  %p574_p9 = scmp.lt.s32.totalorder (!%p403_p3), %s1191_s27, 7 }
   0xe   : > { %vm590_vm0 = vcmask 1043456   ;;  %v1104_v0 = vld [vmem:[%s1410_s6 + $0x8] sm:$0xf]  ;;  %v1116_v1 = vld [vmem:[%s1410_s6 + $0x18] sm:$0xf]  ;;  %s1430_s28 = smov (!%p499_p5, %s1195_s28), 1 }
   0xf   : > { %1105 = vmatpush.msk.msra.mxu2 %vm590_vm0, %v1104_v0  ;;  %v1099_v2 = vld [vmem:[%s1410_s6 + $0x4] sm:$0xf]  ;;  %v583_v3 = vld [vmem:[%s1410_s6] sm:$0xf]  ;;  %v1107_v4 = vld [vmem:[%s1410_s6 + $0xc] sm:$0xf] }
  0x10   : > { %1100 = vmatpush.msk.msra.mxu0 %vm590_vm0, %v1099_v2  ;;  %s502_s23 = scalar_select %p501_p6, %s1290_s14, 17  ;;  %1102 = vmatpush.msk.msra.mxu1 %vm590_vm0, %v583_v3  ;;  %v1110_v5 = vld [vmem:[%s1410_s6 + $0x10] sm:$0xf]  ;;  %v1119_v6 = vld [vmem:[%s1410_s6 + $0x1c] sm:$0xf]  ;;  %vm586_vm1 = vcmask 31744  }
  0x11   : > { %1117 = vmatpush.msk.msrb.mxu2 %vm590_vm0, %v1116_v1  ;;  %1108 = vmatpush.msk.msra.mxu3 %vm590_vm0, %v1107_v4  ;;  %s1320_s13 = smul.u32 36, %s1430_s28  ;;  %v1113_v7 = vld [vmem:[%s1410_s6 + $0x14] sm:$0xf]  ;;  %v1122_v8 = vld [vmem:[%s1410_s6 + $0x20] sm:$0xf]  ;;  %vm643_vm2 = vcmask 1046528  }
  0x12   : > { %1111 = vmatpush.msk.msrb.mxu0 %vm590_vm0, %v1110_v5  ;;  %s1080_s18 = sshll.u32 %s502_s23, 1  ;;  %1114 = vmatpush.msk.msrb.mxu1 %vm590_vm0, %v1113_v7  ;;  %s1432_s15 = smov (!%p1328_p7, %s510_s15), 17  ;;  %v1168_v43 = vld [vmem:[%s1411_s7] ss:$0 sm:$0xff] }
  0x13   : > { %1120 = vmatpush.msk.msrb.mxu3 %vm590_vm0, %v1119_v6  ;;  %s505_s20 = sadd.s32 %s1320_s13, %s1080_s18  ;;  %s1434_s21 = smov (!%p1335_p8, %s523_s21), 17 }
  0x14   : > { %s1081_s22 = sshll.u32 %s505_s20, 3  ;;  %s1083_s14 = sshll.u32 %s1432_s15, 1 }
  0x15   : > { %s507_s12 = scalar_lea.vmem %s1404_s0, %s1081_s22  ;;  %s544_s17 = scalar_lea.vmem %s1407_s3, %s1081_s22 }
  0x16   : > { %v580_v9 = vld [vmem:[%s507_s12] sm:$0xff]  ;;  %v581_v10 = vld [vmem:[%s507_s12 + $0x8] sm:$0x1]  ;;  %s517_s10 = sadd.s32 %s1320_s13, %s1083_s14  ;;  %s1086_s11 = sshll.u32 %s1434_s21, 1 }
  0x17   : > { %v582_v11 = vld [vmem:[%s544_s17] sm:$0xff]  ;;  %v644_v12 = vrot.slane %v580_v9, 1  ;;  %v645_v13 = vrot.slane %v581_v10, 1  ;;  %1103 = vmatmul.msk.f32.vlgmr.msra.gmra.mxu1 %vm586_vm1, %v580_v9  ;;  %s1084_s18 = sshll.u32 %s517_s10, 3  ;;  %s530_s19 = sadd.s32 %s1320_s13, %s1086_s11 }
  0x18   : > { %1101 = vmatmul.msk.f32.vlgmr.msra.gmra.mxu0 %vm586_vm1, %v582_v11  ;;  %s519_s25 = scalar_lea.vmem %s1405_s1, %s1084_s18  ;;  %s1087_s26 = sshll.u32 %s530_s19, 3 }
  0x19   : > { %1123 = vmatpush.msk.msra.mxu0 %vm590_vm0, %v1122_v8  ;;  %v646_v14 = vsel %vm643_vm2, %v644_v12, %v645_v13  ;;  %v673_v15 = vld [vmem:[%s519_s25] sm:$0xff]  ;;  %v674_v16 = vld [vmem:[%s519_s25 + $0x8] sm:$0x1]  ;;  %s532_s15 = scalar_lea.vmem %s1406_s2, %s1087_s26  ;;  %s556_s17 = scalar_lea.vmem %s1408_s4, %s1084_s18 }
  0x1a   : > { %1106 = vmatmul.msk.f32.vlgmr.msra.gmra.mxu2 %vm586_vm1, %v646_v14  ;;  %1109 = vmatmul.msk.f32.vlgmr.msra.gmra.mxu3 %vm586_vm1, %v673_v15  ;;  %v737_v17 = vrot.slane %v673_v15, 1  ;;  %v738_v18 = vrot.slane %v674_v16, 1  ;;  %v767_v19 = vld [vmem:[%s532_s15 + $0x8] sm:$0x1]  ;;  %v675_v20 = vld [vmem:[%s556_s17] sm:$0xff]  ;;  %s569_s14 = scalar_lea.vmem %s1409_s5, %s1087_s26  ;;  %s1436_s27 = smov (!%p574_p9, %s1191_s27), 7 }
  0x1b   : > { %v766_v21 = vld [vmem:[%s532_s15] sm:$0xff]  ;;  %v831_v24 = vrot.slane %v767_v19, 1  ;;  %s1097_s10 = sshll.u32 %s1430_s28, 3 }
  0x1c   : > { %v739_v22 = vsel %vm643_vm2, %v737_v17, %v738_v18  ;;  %v830_v23 = vrot.slane %v766_v21, 1  ;;  %v768_v25 = vld [vmem:[%s569_s14] sm:$0xff]  ;;  %s577_s11 = sadd.s32 %s1097_s10, %s1436_s27 }
  0x1d   : > { %s1098_s20 = sshll.u32 %s577_s11, 3 }
  0x1e   : > { %v832_v26 = vsel %vm643_vm2, %v830_v23, %v831_v24  ;;  %s579_s26 = scalar_lea.vmem %s1412_s8, %s1098_s20 }
  0x1f   : > { %1115 = vmatmul.msk.f32.vlgmr.msrb.gmra.mxu1 %vm586_vm1, %v739_v22 }
  0x20   : > { %1112 = vmatmul.msk.f32.vlgmr.msrb.gmra.mxu0 %vm586_vm1, %v675_v20 }
  0x22   : > { %1118 = vmatmul.msk.f32.vlgmr.msrb.gmra.mxu2 %vm586_vm1, %v766_v21  ;;  %1121 = vmatmul.msk.f32.vlgmr.msrb.gmra.mxu3 %vm586_vm1, %v768_v25 }
  0x28   : > { %1124 = vmatmul.msk.f32.vlgmr.msra.gmra.mxu0 %vm586_vm1, %v832_v26 }
  0x94   : > { %v637_v28 = vpop.f32.mrf.mxu1 }
  0x95   : > { %v611_v27 = vpop.f32.mrf.mxu0 }
  0x96   : > { %v638_v29 = vadd.f32 %v637_v28, %v611_v27 }
  0x9c   : > { %v762_v35 = vpop.f32.mrf.mxu1 }
  0x9d   : > { %v669_v30 = vpop.f32.mrf.mxu2  ;;  %v730_v32 = vpop.f32.mrf.mxu0 }
  0x9e   : > { %v672_v31 = vadd.f32 %v669_v30, %v638_v29  ;;  %v701_v33 = vpop.f32.mrf.mxu3 }
  0xa0   : > { %v704_v34 = vadd.f32 %v701_v33, %v672_v31 }
  0xa2   : > { %v733_v36 = vadd.f32 %v730_v32, %v704_v34 }
  0xa4   : > { %v765_v37 = vadd.f32 %v762_v35, %v733_v36 }
  0xa5   : > { %v794_v38 = vpop.f32.mrf.mxu2  ;;  %v855_v41 = vpop.f32.mrf.mxu0 }
  0xa6   : > { %v797_v39 = vadd.f32 %v794_v38, %v765_v37  ;;  %v823_v40 = vpop.f32.mrf.mxu3 }
  0xa8   : > { %v826_v42 = vadd.f32 %v823_v40, %v797_v39 }
  0xaa   : > { %v858_v44 = vadd.f32 %v855_v41, %v826_v42 }
  0xac   : > { %v863_v45 = vadd.f32 %v1168_v43, %v858_v44 }
  0xae   : > { %vm864_vm3 = vcmp.ge.f32.partialorder %v863_v45, 0.0  ;;  %v865_v46 = vmul.f32 0.01, %v863_v45 }
  0xb0   : > { %v866_v47 = vsel %vm864_vm3, %v863_v45, %v865_v46 }
  0xb1   : > { %867 = vst.msk [vmem:[%s579_s26] sm:$0xff] %vm586_vm1, %v866_v47 }
  0xb2 PF: > { %s18_s9 = sadd.s32 1, %s1207_s9   ;;  %s1417_s24 = sld [smem:[#allocation2_spill]] }
  0xb3   : > { %p15_p10 = scmp.ge.s32.totalorder %s18_s9, 18   ;;  %s1418_s12 = sld [smem:[#allocation3_spill]] }
  0xb4   : > { %s1419_s27 = smov %s1199_s29  ;;  %s1420_s28 = smov %s1203_s30 }
  0xb5   :  { %17 = sbr.rel (!%p15_p10) target bundleno = 3 (0x3), region = 105 }
  0xb8   : > { %s1421_s29 = smov %s1417_s24 }
  0xb9   : > { %s1422_s30 = smov %s1418_s12 }

</bundles_post_ra>
